<compile_context>
chip_gen: v5e
topology: v5e:2x2
jax: 0.10.0
libtpu: 0.0.40
codegen_flags: <defaults>
</compile_context>

<pallas_src>
from functools import partial

import jax
import jax.numpy as jnp
from jax.experimental import pallas as pl
from jax.experimental.pallas import tpu as pltpu


def _round_up(x, m):
    return (x + m - 1) // m * m


# ----------------------------------------------------------------------------
# Folded rel kernel:  rel_logits = vr @ W_comb + b_comb
# Grid = (row tiles ["parallel"],).  W_comb/b_comb resident in VMEM.
# vr arrives f32 and is cast to bf16 in-register just before the MXU dot.
# ----------------------------------------------------------------------------
def _rel_logits_kernel(vr_ref, w_ref, b_ref, out_ref):
    x = vr_ref[...].astype(jnp.bfloat16)                       # VPU cast, cheap
    acc = jnp.dot(x, w_ref[...], preferred_element_type=jnp.float32)
    out_ref[...] = (acc + b_ref[...]).astype(out_ref.dtype)


def rel_logits_pallas(vr, w_comb, b_comb, num_rel_cls):
    """rel_logits = vr @ w_comb + b_comb, then slice to num_rel_cls classes."""
    n, k = vr.shape
    k_w, n_out_pad = w_comb.shape
    assert k == k_w and n_out_pad % 128 == 0

    # Row tiling: block == full array for small N (exempt from (8,128));
    # otherwise 128-row tiles (>=2 parallel tiles -> both v7x TCs), 256 for
    # large N.  A non-dividing last block is masked by Pallas.
    if n <= 128:
        tm = n
    elif n <= 1024:
        tm = 128
    else:
        tm = 256
    grid = (pl.cdiv(n, tm),)

    flops = 2 * n * k * n_out_pad
    bytes_accessed = (n * k * vr.dtype.itemsize          # vr (read once)
                      + k * n_out_pad * 2                 # W_comb (resident)
                      + n_out_pad * 4                     # b_comb
                      + n * n_out_pad * 4)                # rel_logits writeback

    out = pl.pallas_call(
        _rel_logits_kernel,
        out_shape=jax.ShapeDtypeStruct((n, n_out_pad), jnp.float32),
        grid=grid,
        in_specs=[
            pl.BlockSpec((tm, k), lambda i: (i, 0)),           # vr row tile (f32)
            pl.BlockSpec((k, n_out_pad), lambda i: (0, 0)),    # W_comb, resident
            pl.BlockSpec((1, n_out_pad), lambda i: (0, 0)),    # b_comb, resident
        ],
        out_specs=pl.BlockSpec((tm, n_out_pad), lambda i: (i, 0)),
        compiler_params=pltpu.CompilerParams(
            dimension_semantics=("parallel",),
            vmem_limit_bytes=32 * 1024 * 1024),
        cost_estimate=pl.CostEstimate(
            flops=flops, transcendentals=0, bytes_accessed=bytes_accessed),
    )(vr, w_comb, b_comb)
    return out[:, :num_rel_cls]


# ----------------------------------------------------------------------------
# One-time parameter preprocessing (outside the jitted forward): fold the two
# linears and pre-cast/pre-pad to the kernel's layout.
# Valid only because no GGNN / nonlinearity sits between them in this path.
# ----------------------------------------------------------------------------
def prepare_rel_params(w_rel, b_rel, w_out, b_out):
    k, hidden = w_rel.shape
    hidden2, n_out = w_out.shape
    assert hidden == hidden2
    n_out_pad = _round_up(n_out, 128)

    w_rel32 = w_rel.astype(jnp.float32)
    w_out32 = w_out.astype(jnp.float32)
    w_comb = jnp.dot(w_rel32, w_out32)                                  # (K, n_out)
    b_comb = jnp.dot(b_rel.astype(jnp.float32), w_out32) + b_out.astype(jnp.float32)

    w_comb_p = jnp.zeros((k, n_out_pad), jnp.bfloat16).at[:, :n_out].set(
        w_comb.astype(jnp.bfloat16))
    b_comb_p = jnp.zeros((1, n_out_pad), jnp.float32).at[0, :n_out].set(b_comb)
    return {"w_comb": w_comb_p, "b_comb": b_comb_p}


# ----------------------------------------------------------------------------
# Forward pass (mode='sgcls', refine_obj_cls=False, obj_labels=None)
# ----------------------------------------------------------------------------
@partial(jax.jit, static_argnames=("num_rel_cls",))
def ggnn_rel_reason_forward(im_inds, obj_fmaps, obj_logits, rel_inds, vr, params,
                            *, num_rel_cls):
    # mode == 'sgcls': obj_logits passed through unchanged (no NMS / onehot path).
    del im_inds, rel_inds
    # TODO(synk): GGNN per-image message passing (enumerate_by_image) is not
    # defined in the provided source; obj_fmaps / obj_proj only feed that path,
    # so they are dead code here and rel_logits come from the folded
    # rel_proj + read-out projection only.
    del obj_fmaps

    rel_logits = rel_logits_pallas(
        vr, params["w_comb"], params["b_comb"], num_rel_cls)

    # refine_obj_cls=False -> obj_logits unchanged.
    # obj_preds = softmax(obj_logits)[:, 1:].max(1)[1] + 1; softmax is monotonic
    # so argmax on the raw logits is identical.  Tiny O(N*C) op: plain XLA,
    # a pallas_call's fixed overhead would dominate.
    obj_preds = jnp.argmax(obj_logits[:, 1:], axis=1).astype(jnp.int32) + 1

    return obj_logits, obj_preds, rel_logits


# ----------------------------------------------------------------------------
# Example
# ----------------------------------------------------------------------------
if __name__ == "__main__":
    NUM_OBJ = 8
    NUM_REL = 16
    OBJ_DIM = 256       # stands in for obj_dim=4096
    REL_DIM = 256       # stands in for rel_dim=4096
    HIDDEN = 128        # stands in for hidden_dim=512
    NUM_OBJ_CLS = 32    # stands in for 151
    NUM_REL_CLS = 16    # stands in for 51

    key = jax.random.PRNGKey(0)
    ks = jax.random.split(key, 8)

    obj_fmaps = jax.random.normal(ks[0], (NUM_OBJ, OBJ_DIM), jnp.float32)
    vr = jax.random.normal(ks[1], (NUM_REL, REL_DIM), jnp.float32)
    obj_logits = jax.random.normal(ks[2], (NUM_OBJ, NUM_OBJ_CLS), jnp.float32)
    im_inds = jnp.zeros((NUM_OBJ,), jnp.int32)
    rel_pairs = jax.random.randint(ks[3], (NUM_REL, 2), 0, NUM_OBJ, jnp.int32)
    rel_inds = jnp.concatenate(
        [jnp.zeros((NUM_REL, 1), jnp.int32), rel_pairs], axis=1)

    def init_linear(k, fin, fout):
        kw, kb = jax.random.split(k)
        bound = 1.0 / float(fin) ** 0.5
        w = jax.random.uniform(kw, (fin, fout), jnp.float32, -bound, bound)
        b = jax.random.uniform(kb, (fout,), jnp.float32, -bound, bound)
        return w, b

    w_rel, b_rel = init_linear(ks[5], REL_DIM, HIDDEN)
    w_out, b_out = init_linear(ks[6], HIDDEN, NUM_REL_CLS)

    # One-time preprocessing (fold + cast + pad), outside the jitted forward.
    params = prepare_rel_params(w_rel, b_rel, w_out, b_out)

    obj_logits_out, obj_preds, rel_logits = ggnn_rel_reason_forward(
        im_inds, obj_fmaps, obj_logits, rel_inds, vr, params,
        num_rel_cls=NUM_REL_CLS)
    jax.block_until_ready((obj_logits_out, obj_preds, rel_logits))

    # Shape / dtype checks.
    assert obj_logits_out.shape == (NUM_OBJ, NUM_OBJ_CLS)
    assert obj_preds.shape == (NUM_OBJ,)
    assert obj_preds.dtype == jnp.int32
    assert bool(jnp.all(obj_preds >= 1)) and bool(jnp.all(obj_preds < NUM_OBJ_CLS))
    assert rel_logits.shape == (NUM_REL, NUM_REL_CLS)

    # Numerical check vs. the (f32) two-linear reference.  bf16 weights /
    # activations with f32 accumulation -> ~1e-3 relative error expected.
    ref_rel = (vr @ w_rel + b_rel) @ w_out + b_out
    err = float(jnp.max(jnp.abs(rel_logits - ref_rel)))
    scale = float(jnp.max(jnp.abs(ref_rel))) + 1e-6
    assert err / scale < 3e-2, f"rel_logits mismatch: {err} (scale {scale})"

    ref_preds = jnp.argmax(obj_logits[:, 1:], axis=1) + 1
    assert bool(jnp.all(obj_preds == ref_preds))

    print("KERNEL_OK")
</pallas_src>

<mosaic_0001>
module attributes {stable_mosaic.version = 11 : i64} {
  func.func @_rel_logits_kernel(%arg0: i32, %arg1: memref<16x256xf32, #tpu.memory_space<vmem>>, %arg2: memref<256x128xbf16, #tpu.memory_space<vmem>>, %arg3: memref<1x128xf32, #tpu.memory_space<vmem>>, %arg4: memref<16x128xf32, #tpu.memory_space<vmem>>) attributes {dimension_semantics = [#tpu.dimension_semantics<parallel>], iteration_bounds = array<i64: 1>, scalar_prefetch = 0 : i64, scratch_operands = 0 : i64, tpu.core_type = #tpu.core_type<tc>, window_params = [{transform_indices = @transform_0, window_bounds = array<i64: 16, 256>}, {pipeline_mode = #tpu.pipeline_mode<synchronous>, transform_indices = @transform_1, window_bounds = array<i64: 256, 128>}, {pipeline_mode = #tpu.pipeline_mode<synchronous>, transform_indices = @transform_2, window_bounds = array<i64: 1, 128>}, {transform_indices = @transform_3, window_bounds = array<i64: 16, 128>}]} {
    %c0 = arith.constant 0 : index
    %c0_0 = arith.constant 0 : index
    %0 = vector.load %arg1[%c0, %c0_0] : memref<16x256xf32, #tpu.memory_space<vmem>>, vector<16x256xf32>
    %1 = arith.truncf %0 : vector<16x256xf32> to vector<16x256xbf16>
    %c0_1 = arith.constant 0 : index
    %c0_2 = arith.constant 0 : index
    %2 = vector.load %arg2[%c0_1, %c0_2] : memref<256x128xbf16, #tpu.memory_space<vmem>>, vector<256x128xbf16>
    %cst = arith.constant dense<0.000000e+00> : vector<16x128xf32>
    %3 = tpu.matmul %1, %2, %cst {dimension_numbers = #tpu.dot_dimension_numbers<[1], [0], [0], [1], [0, 0, 1, 1], [], []>} : vector<16x256xbf16>, vector<256x128xbf16>, vector<16x128xf32> -> vector<16x128xf32>
    %c0_3 = arith.constant 0 : index
    %c0_4 = arith.constant 0 : index
    %4 = vector.load %arg3[%c0_3, %c0_4] : memref<1x128xf32, #tpu.memory_space<vmem>>, vector<1x128xf32>
    %5 = vector.broadcast %4 : vector<1x128xf32> to vector<16x128xf32>
    %6 = arith.addf %3, %5 : vector<16x128xf32>
    %c0_5 = arith.constant 0 : index
    %c0_6 = arith.constant 0 : index
    %7 = vector.load %arg4[%c0_5, %c0_6] : memref<16x128xf32, #tpu.memory_space<vmem>>, vector<16x128xf32>
    tpu.vector_store %arg4[%c0_5, %c0_6], %6 {strides = array<i32>} : memref<16x128xf32, #tpu.memory_space<vmem>>, vector<16x128xf32>,
    return
  }
  func.func @transform_0(%arg0: i32) -> (i32, i32) {
    %c0_i32 = arith.constant 0 : i32
    %c0_i32_0 = arith.constant 0 : i32
    return %arg0, %c0_i32 : i32, i32
  }
  func.func @transform_1(%arg0: i32) -> (i32, i32) {
    %c0_i32 = arith.constant 0 : i32
    %c0_i32_0 = arith.constant 0 : i32
    %c0_i32_1 = arith.constant 0 : i32
    return %c0_i32, %c0_i32_0 : i32, i32
  }
  func.func @transform_2(%arg0: i32) -> (i32, i32) {
    %c0_i32 = arith.constant 0 : i32
    %c0_i32_0 = arith.constant 0 : i32
    %c0_i32_1 = arith.constant 0 : i32
    return %c0_i32, %c0_i32_0 : i32, i32
  }
  func.func @transform_3(%arg0: i32) -> (i32, i32) {
    %c0_i32 = arith.constant 0 : i32
    %c0_i32_0 = arith.constant 0 : i32
    return %arg0, %c0_i32 : i32, i32
  }
}

</mosaic_0001>

<bundles_post_ra>
// kernel: ggnn_rel_reason_forward.1
= control target key start
LH: loop header
LB: loop body
LE: loop exit
PB: predicated region body
PF: predicated region fallthrough
CT: control target
= control target key end

     0   :  { %8 = vsyncpa [#allocation3], 0  ;;  %s444_s0 = inlined_call_operand.hbm [shape: f32[16,256], index: 0, kind: input, shape index: {}]   ;;  %s445_s1 = inlined_call_operand.hbm [shape: bf16[256,128], index: 1, kind: input, shape index: {}]   ;;  %s446_s2 = inlined_call_operand.vmem [shape: f32[1,128], index: 2, kind: input, shape index: {}]   ;;  %s447_s3 = inlined_call_operand.hbm [shape: f32[16,128], index: 3, kind: output, shape index: {}]  }
   0x1   :  { %9 = vsyncpa [#allocation6], 0 }
   0x2   :  { %10 = vsyncpa [#allocation4], 0  ;;  %s15_s14 = sshll.u32 %s444_s0, 4  ;;  %s403_s15 = smov [#allocation2]   ;;  %s16_s14 = int_to_ptr.hbm [resolvable:$true] %s15_s14 }
   0x3   :  { %s17_s16 = sshll.u32 %s403_s15, 4  ;;  %s28_s19 = sshll.u32 %s445_s1, 4  ;;  %s18_s16 = int_to_ptr.vmem [resolvable:$true] %s17_s16  ;;  %s29_s19 = int_to_ptr.hbm [resolvable:$true] %s28_s19 }
   0x4   :  { %s404_s20 = smov 256   ;;  %s405_s21 = smov 16  }
   0x5   :  { %23 = dma.hbm_to_vmem [thread:$0]  %s16_s14, 512, %s18_s16, [#allocation3], %s404_s20, %s404_s20, %s405_s21  }
   0x6   :  { %s406_s22 = smov [#allocation5]   ;;  %s407_s24 = smov 64  }
   0x7   :  { %s30_s23 = sshll.u32 %s406_s22, 4  ;;  %s408_s25 = smov 4   ;;  %s31_s23 = int_to_ptr.vmem [resolvable:$true] %s30_s23 }
   0x8   :  { %36 = dma.hbm_to_vmem [thread:$0]  %s29_s19, 2048, %s31_s23, [#allocation6], %s407_s24, %s407_s24, %s408_s25  }
   0x9   :  { %397 = dma.done.wait [#allocation3], 512  }
   0xa   :  { %398 = vsyncadd [#allocation3], 4294966784 }
   0xb   :  { %399 = dma.done.wait [#allocation6], 2048  }
   0xc   :  { %400 = vsyncadd [#allocation6], 4294965248  ;;  %v306_v0 = vld [vmem:[#allocation5 + $0x38] sm:$0xff]  ;;  %v305_v2 = vld [vmem:[#allocation5 + $0x30] sm:$0xff]  ;;  %s409_s26 = smov [#allocation7]   ;;  %s221_s30 = sshll.u32 %s447_s3, 4  ;;  %s222_s30 = int_to_ptr.hbm [resolvable:$true] %s221_s30 }
   0xd   :  { %v314_v1 = vld [vmem:[#allocation5 + $0x78] sm:$0xff]  ;;  %185 = vmatpush.bf16.msra.mxu0 %v306_v0  ;;  %v313_v3 = vld [vmem:[#allocation5 + $0x70] sm:$0xff]  ;;  %v304_v4 = vld [vmem:[#allocation5 + $0x28] sm:$0xff]  ;;  %s219_s27 = sshll.u32 %s409_s26, 4  ;;  %s410_s4 = smov 128   ;;  %s220_s27 = int_to_ptr.vmem [resolvable:$true] %s219_s27 }
   0xe   :  { %199 = vmatpush.bf16.msra.mxu1 %v314_v1  ;;  %v312_v5 = vld [vmem:[#allocation5 + $0x68] sm:$0xff]  ;;  %v303_v6 = vld [vmem:[#allocation5 + $0x20] sm:$0xff]  ;;  %v302_v8 = vld [vmem:[#allocation5 + $0x18] sm:$0xff] }
   0xf   :  { %v311_v7 = vld [vmem:[#allocation5 + $0x60] sm:$0xff]  ;;  %v310_v9 = vld [vmem:[#allocation5 + $0x58] sm:$0xff]  ;;  %v301_v10 = vld [vmem:[#allocation5 + $0x10] sm:$0xff] }
  0x10   :  { %v309_v11 = vld [vmem:[#allocation5 + $0x50] sm:$0xff]  ;;  %v300_v12 = vld [vmem:[#allocation5 + $0x8] sm:$0xff]  ;;  %v299_v14 = vld [vmem:[#allocation5] sm:$0xff] }
  0x11   :  { %186 = vmatpush.bf16.msra.mxu0 %v305_v2  ;;  %v308_v13 = vld [vmem:[#allocation5 + $0x48] sm:$0xff]  ;;  %v307_v15 = vld [vmem:[#allocation5 + $0x40] sm:$0xff]  ;;  %v49_v17 = vld [vmem:[#allocation2 + $0x10] sm:$0xff] }
  0x12   :  { %200 = vmatpush.bf16.msra.mxu1 %v313_v3  ;;  %v47_v16 = vld [vmem:[#allocation2] sm:$0xff]  ;;  %v48_v18 = vld [vmem:[#allocation2 + $0x8] sm:$0xff]  ;;  %v50_v19 = vld [vmem:[#allocation2 + $0x18] sm:$0xff] }
  0x13   :  { %v51_v20 = vpack.c.bf16 %v49_v17, %v47_v16  ;;  %v52_v21 = vpack.c.bf16 %v50_v19, %v48_v18  ;;  %v324_v22 = vld [vmem:[%s446_s2] ss:$0 sm:$0xff]  ;;  %s411_s2 = smov 8  }
  0x15   :  { %187 = vmatpush.bf16.msra.mxu0 %v304_v4 }
  0x16   :  { %201 = vmatpush.bf16.msra.mxu1 %v312_v5 }
  0x19   :  { %188 = vmatpush.bf16.msra.mxu0 %v303_v6 }
  0x1a   :  { %202 = vmatpush.bf16.msra.mxu1 %v311_v7 }
  0x1d   :  { %189 = vmatpush.bf16.msra.mxu0 %v302_v8 }
  0x1e   :  { %203 = vmatpush.bf16.msra.mxu1 %v310_v9 }
  0x21   :  { %190 = vmatpush.bf16.msra.mxu0 %v301_v10 }
  0x22   :  { %204 = vmatpush.bf16.msra.mxu1 %v309_v11 }
  0x25   :  { %191 = vmatpush.bf16.msra.mxu0 %v300_v12 }
  0x26   :  { %205 = vmatpush.bf16.msra.mxu1 %v308_v13 }
  0x29   :  { %192 = vmatpush.bf16.msra.mxu0 %v299_v14 }
  0x2a   :  { %206 = vmatpush.bf16.msra.mxu1 %v307_v15 }
  0x2c   :  { %193 = vmatmul.bf16.vlgmr.msra.gmra.mxu0 %v51_v20 }
  0x2d   :  { %207 = vmatmul.bf16.vlgmr.msra.gmra.mxu1 %v52_v21 }
  0xa9   :  { %v194_v23 = vpop.f32.mrf.mxu0 }
  0xaa   :  { %v208_v24 = vpop.f32.mrf.mxu1  ;;  %v195_v25 = vadd.f32 %v324_v22, %v194_v23 }
  0xac   :  { %v209_v26 = vadd.f32 %v208_v24, %v195_v25 }
  0xae   :  { %213 = vst [vmem:[#allocation7] sm:$0xff] %v209_v26 }
  0xb1   :  { %v196_v27 = vpop.f32.mrf.mxu0 }
  0xb2   :  { %v197_v28 = vadd.f32 %v324_v22, %v196_v27  ;;  %v210_v29 = vpop.f32.mrf.mxu1 }
  0xb4   :  { %v211_v30 = vadd.f32 %v210_v29, %v197_v28 }
  0xb6   :  { %214 = vst [vmem:[#allocation7 + $0x8] sm:$0xff] %v211_v30 }
  0xb7   :  { %227 = dma.vmem_to_hbm [thread:$0]  %s220_s27, 256, %s222_s30, [#allocation4], %s410_s4, %s410_s4, %s411_s2  }
  0xb8   :  { %401 = dma.done.wait [#allocation4], 256  }
  0xb9   :  { %402 = vsyncadd [#allocation4], 4294967040 }
  0xba   :  { %232 = vsyncpa [#allocation3], 1 }
  0xbb   :  { %233 = vsyncpa [#allocation6], 1 }
  0xbc   :  { %234 = vsyncpa [#allocation4], 1 }

</bundles_post_ra>
